<compile_context>
chip_gen: v6e
topology: v6e:2x2x1
jax: 0.10.0
libtpu: 0.0.40
codegen_flags: <defaults>
</compile_context>

<pallas_src>
import functools
from typing import NamedTuple

import jax
import jax.numpy as jnp
from jax.experimental import pallas as pl
from jax.experimental.pallas import tpu as pltpu

LANE = 128


def _round_up(v, m):
    return (v + m - 1) // m * m


def _pad2(a, rows, cols):
    return jnp.pad(a, ((0, rows - a.shape[0]), (0, cols - a.shape[1])))


def _vmem_limit_bytes():
    # Generation-aware scoped VMEM: ~3/4 of physical (v5e/v6e: 128 MiB -> 96 MiB,
    # v7x: 64 MiB -> 48 MiB), capped at 100 MiB.  Fallback is v7x-safe.
    try:
        cap = pltpu.get_tpu_info().vmem_capacity_bytes
        return min(int(cap * 3 // 4), 100 * 1024 * 1024)
    except Exception:
        return 48 * 1024 * 1024


_VMEM_LIMIT = _vmem_limit_bytes()


def _cparams():
    return pltpu.CompilerParams(
        dimension_semantics=("parallel",),  # row-tile axis -> both TCs on v7x
        vmem_limit_bytes=_VMEM_LIMIT,
    )


def _fits_vmem(tm, n_pad, f_resident):
    # Conservative budget: double-buffered bf16 adj row tile + (assumed
    # double-buffered) resident bf16 support block + output tiles.
    adj_bytes = 2 * tm * n_pad * 2
    sup_bytes = 2 * n_pad * f_resident * 2
    out_bytes = 4 * tm * f_resident * 4
    return adj_bytes + sup_bytes + out_bytes < int(_VMEM_LIMIT * 0.8)


def _choose_tile(n_raw, block_rows, f_resident):
    """Pick row tile tm and padded node count n_pad (python ints, trace time)."""
    n_pad0 = _round_up(n_raw, 8)
    tm = min(_round_up(block_rows, 8), n_pad0)
    # Keep >= 2 row tiles where possible so "parallel" can use both v7x TCs.
    if n_pad0 <= tm and n_pad0 >= 16:
        tm = _round_up((n_pad0 + 1) // 2, 8)
    # Shrink until the working set fits the scoped-VMEM budget.
    while tm > 8 and not _fits_vmem(tm, _round_up(n_pad0, tm), f_resident):
        tm = max(8, ((tm // 2) // 8) * 8)
    n_pad = _round_up(n_pad0, tm)
    return tm, n_pad


# --------------------------------------------------------------------------
# Kernel bodies
# --------------------------------------------------------------------------
def _support_kernel(x_ref, w_ref, s_ref):
    # s_tile = x_tile @ W1   (bf16 operands, f32 accumulate, bf16 store)
    s_ref[...] = jnp.dot(
        x_ref[...], w_ref[...], preferred_element_type=jnp.float32
    ).astype(s_ref.dtype)


def _agg_relu_support_kernel(adj_ref, s_ref, b_ref, w_ref, out_ref):
    # s2_tile = relu(adj_tile @ s1 + b1) @ W2    (h1 never materialized in HBM)
    h = jnp.dot(adj_ref[...], s_ref[...], preferred_element_type=jnp.float32)
    h = jnp.maximum(h + b_ref[...], 0.0)
    out_ref[...] = jnp.dot(
        h.astype(w_ref.dtype), w_ref[...], preferred_element_type=jnp.float32
    ).astype(out_ref.dtype)


def _agg_relu_head_kernel(adj_ref, s_ref, b_ref, wp_ref, bp_ref, out_ref):
    # out_tile = relu(adj_tile @ s2 + b2) @ Wp + bp   (Linear head fused in)
    h = jnp.dot(adj_ref[...], s_ref[...], preferred_element_type=jnp.float32)
    h = jnp.maximum(h + b_ref[...], 0.0)
    out_ref[...] = (
        jnp.dot(h.astype(wp_ref.dtype), wp_ref[...],
                preferred_element_type=jnp.float32)
        + bp_ref[...]
    )


# --------------------------------------------------------------------------
# pallas_call wrappers (row-tiled 1-D grids)
# --------------------------------------------------------------------------
def _support_matmul(x, w, tm):
    n, f_in = x.shape
    f_out = w.shape[1]
    return pl.pallas_call(
        _support_kernel,
        out_shape=jax.ShapeDtypeStruct((n, f_out), jnp.bfloat16),
        grid_spec=pltpu.PrefetchScalarGridSpec(
            num_scalar_prefetch=0,
            grid=(n // tm,),
            in_specs=[
                pl.BlockSpec((tm, f_in), lambda i: (i, 0)),      # x row tile
                pl.BlockSpec((f_in, f_out), lambda i: (0, 0)),   # W1 (grid-invariant)
            ],
            out_specs=pl.BlockSpec((tm, f_out), lambda i: (i, 0)),
        ),
        compiler_params=_cparams(),
        cost_estimate=pl.CostEstimate(
            flops=2 * n * f_in * f_out,
            transcendentals=0,
            bytes_accessed=2 * (n * f_in + f_in * f_out + n * f_out),
        ),
    )(x, w)


def _aggregate_support(adj, s1, b1, w2, tm):
    # s2 = relu(adj @ s1 + b1) @ W2
    n = adj.shape[0]
    f1 = s1.shape[1]
    f2 = w2.shape[1]
    return pl.pallas_call(
        _agg_relu_support_kernel,
        out_shape=jax.ShapeDtypeStruct((n, f2), jnp.bfloat16),
        grid_spec=pltpu.PrefetchScalarGridSpec(
            num_scalar_prefetch=0,
            grid=(n // tm,),
            in_specs=[
                pl.BlockSpec((tm, n), lambda i: (i, 0)),     # adj row tile (streamed)
                pl.BlockSpec((n, f1), lambda i: (0, 0)),     # resident support s1
                pl.BlockSpec((1, f1), lambda i: (0, 0)),     # b1 (f32)
                pl.BlockSpec((f1, f2), lambda i: (0, 0)),    # W2 (bf16)
            ],
            out_specs=pl.BlockSpec((tm, f2), lambda i: (i, 0)),
        ),
        compiler_params=_cparams(),
        cost_estimate=pl.CostEstimate(
            flops=2 * n * n * f1 + 2 * n * f1 * f2,
            transcendentals=0,
            bytes_accessed=2 * (n * n + n * f1 + f1 * f2 + n * f2) + 4 * f1,
        ),
    )(adj, s1, b1, w2)


def _aggregate_head(adj, s2, b2, wp, bp, tm):
    # out = relu(adj @ s2 + b2) @ Wp + bp
    n = adj.shape[0]
    f2 = s2.shape[1]
    f3 = wp.shape[1]
    return pl.pallas_call(
        _agg_relu_head_kernel,
        out_shape=jax.ShapeDtypeStruct((n, f3), jnp.float32),
        grid_spec=pltpu.PrefetchScalarGridSpec(
            num_scalar_prefetch=0,
            grid=(n // tm,),
            in_specs=[
                pl.BlockSpec((tm, n), lambda i: (i, 0)),     # adj row tile (streamed)
                pl.BlockSpec((n, f2), lambda i: (0, 0)),     # resident support s2
                pl.BlockSpec((1, f2), lambda i: (0, 0)),     # b2 (f32)
                pl.BlockSpec((f2, f3), lambda i: (0, 0)),    # Wp (bf16)
                pl.BlockSpec((1, f3), lambda i: (0, 0)),     # bp (f32)
            ],
            out_specs=pl.BlockSpec((tm, f3), lambda i: (i, 0)),
        ),
        compiler_params=_cparams(),
        cost_estimate=pl.CostEstimate(
            flops=2 * n * n * f2 + 2 * n * f2 * f3,
            transcendentals=0,
            bytes_accessed=2 * (n * n + n * f2 + f2 * f3)
            + 4 * (f2 + f3 + n * f3),
        ),
    )(adj, s2, b2, wp, bp)


# --------------------------------------------------------------------------
# One-time preparation (hoisted pad + bf16 cast of static operands)
# --------------------------------------------------------------------------
class GCNPrepared(NamedTuple):
    adj: jax.Array  # (n_pad, n_pad) bf16
    w1: jax.Array   # (f0, f1) bf16
    b1: jax.Array   # (1, f1)  f32
    w2: jax.Array   # (f1, f2) bf16
    b2: jax.Array   # (1, f2)  f32
    wp: jax.Array   # (f2, f3) bf16
    bp: jax.Array   # (1, f3)  f32


def prepare_gcn(adj, params, *, block_rows=512):
    """Pad + bf16-cast the static graph/weights ONCE (adj pad/cast alone is
    ~N^2 of HBM traffic, so it must not run on every forward)."""
    w1, b1, w2, b2, wp, bp = params
    n = adj.shape[0]
    nfeat, nhid = w1.shape
    nhid2, nout = w2.shape[1], wp.shape[1]
    f0 = _round_up(nfeat, LANE)
    f1 = _round_up(nhid, LANE)
    f2 = _round_up(nhid2, LANE)
    f3 = _round_up(nout, LANE)

    tm, n_pad = _choose_tile(n, block_rows, max(f1, f2))

    prep = GCNPrepared(
        adj=_pad2(adj, n_pad, n_pad).astype(jnp.bfloat16),
        w1=_pad2(w1, f0, f1).astype(jnp.bfloat16),
        b1=_pad2(b1, 1, f1).astype(jnp.float32),
        w2=_pad2(w2, f1, f2).astype(jnp.bfloat16),
        b2=_pad2(b2, 1, f2).astype(jnp.float32),
        wp=_pad2(wp, f2, f3).astype(jnp.bfloat16),
        bp=_pad2(bp, 1, f3).astype(jnp.float32),
    )
    return prep, tm


# --------------------------------------------------------------------------
# Forward pass
# --------------------------------------------------------------------------
@functools.partial(jax.jit, static_argnames=("n_out", "tm"))
def gcn_forward(x, prep: GCNPrepared, *, n_out, tm):
    """GCN forward (eval mode): two GraphConvolutions + Linear head."""
    n = x.shape[0]
    n_pad = prep.adj.shape[0]
    f0 = prep.w1.shape[0]

    # Only x is padded/cast per call; the static graph & weights are prepared once.
    # Zero padding is exact: padded adj columns are zero, so padded rows of the
    # intermediate supports (which become relu(bias) @ W != 0) never reach real
    # output rows, and padded output rows/cols are sliced off below.
    xb = _pad2(x, n_pad, f0).astype(jnp.bfloat16)

    # Layer 1 support: s1 = x @ W1
    s1 = _support_matmul(xb, prep.w1, tm)

    # Dropout: eval mode (training=False) -> identity.
    # TODO(synk): training-mode dropout would use pltpu.prng_seed/prng_random_bits.

    # Layer-1 aggregation fused with layer-2 support: s2 = relu(adj @ s1 + b1) @ W2
    s2 = _aggregate_support(prep.adj, s1, prep.b1, prep.w2, tm)

    # Layer-2 aggregation fused with the Linear head: out = relu(adj @ s2 + b2) @ Wp + bp
    out_pad = _aggregate_head(prep.adj, s2, prep.b2, prep.wp, prep.bp, tm)

    return out_pad[:n, :n_out]


# --------------------------------------------------------------------------
# Parameter init + references
# --------------------------------------------------------------------------
def init_params(key, nfeat, nhid, n_output):
    """GraphConvolution: uniform(-1/sqrt(out), 1/sqrt(out)) for weight & bias.
    nn.Linear(64, n_output): uniform(-1/sqrt(64), 1/sqrt(64)); weight stored (64, n_output)."""
    k1, k2, k3, k4, k5, k6 = jax.random.split(key, 6)
    s1 = 1.0 / jnp.sqrt(jnp.float32(nhid))
    s2 = 1.0 / jnp.sqrt(jnp.float32(64))
    s3 = 1.0 / jnp.sqrt(jnp.float32(64))
    w1 = jax.random.uniform(k1, (nfeat, nhid), jnp.float32, -s1, s1)
    b1 = jax.random.uniform(k2, (1, nhid), jnp.float32, -s1, s1)
    w2 = jax.random.uniform(k3, (nhid, 64), jnp.float32, -s2, s2)
    b2 = jax.random.uniform(k4, (1, 64), jnp.float32, -s2, s2)
    wp = jax.random.uniform(k5, (64, n_output), jnp.float32, -s3, s3)
    bp = jax.random.uniform(k6, (1, n_output), jnp.float32, -s3, s3)
    return w1, b1, w2, b2, wp, bp


def reference_forward_bf16(x, adj, params):
    """Plain-JAX reference mirroring the kernel numerics (bf16 ops, f32 accumulate)."""
    w1, b1, w2, b2, wp, bp = params
    bf, f32 = jnp.bfloat16, jnp.float32
    xb, ab = x.astype(bf), adj.astype(bf)
    s1 = jnp.dot(xb, w1.astype(bf), preferred_element_type=f32).astype(bf)
    h1 = jnp.maximum(jnp.dot(ab, s1, preferred_element_type=f32) + b1, 0.0)
    s2 = jnp.dot(h1.astype(bf), w2.astype(bf), preferred_element_type=f32).astype(bf)
    h2 = jnp.maximum(jnp.dot(ab, s2, preferred_element_type=f32) + b2, 0.0)
    return jnp.dot(h2.astype(bf), wp.astype(bf), preferred_element_type=f32) + bp


def reference_forward_f32(x, adj, params):
    """True float32 reference (PyTorch-equivalent numerics, eval mode)."""
    w1, b1, w2, b2, wp, bp = params
    hi = jax.lax.Precision.HIGHEST
    h1 = jnp.maximum(jnp.dot(adj, jnp.dot(x, w1, precision=hi), precision=hi) + b1, 0.0)
    h2 = jnp.maximum(jnp.dot(adj, jnp.dot(h1, w2, precision=hi), precision=hi) + b2, 0.0)
    return jnp.dot(h2, wp, precision=hi) + bp


if __name__ == "__main__":
    # Small, module-consistent shapes: N nodes, nfeat input features.
    N, NFEAT, NHID, NOUT = 256, 16, 32, 8
    DROPOUT = 0.5  # unused at inference (eval mode)

    key = jax.random.PRNGKey(0)
    kx, ka, kp = jax.random.split(key, 3)

    x = jax.random.normal(kx, (N, NFEAT), jnp.float32)

    # Symmetric, row-normalized dense adjacency with self-loops.
    a = jax.random.uniform(ka, (N, N), jnp.float32)
    a = (a + a.T) * 0.5 + jnp.eye(N, dtype=jnp.float32)
    adj = a / jnp.sum(a, axis=1, keepdims=True)

    params = init_params(kp, NFEAT, NHID, NOUT)

    # Hoisted, one-time padding / bf16 cast of the static graph and weights.
    prep, tm = prepare_gcn(adj, params, block_rows=512)

    out = gcn_forward(x, prep, n_out=NOUT, tm=tm)
    jax.block_until_ready(out)
    assert out.shape == (N, NOUT)

    ref_bf16 = reference_forward_bf16(x, adj, params)
    ref_f32 = reference_forward_f32(x, adj, params)
    err_bf16 = float(jnp.max(jnp.abs(out - ref_bf16)))
    err_f32 = float(jnp.max(jnp.abs(out - ref_f32)))
    assert jnp.allclose(out, ref_bf16, atol=1e-2, rtol=1e-2), f"bf16-mirror max err {err_bf16}"
    assert jnp.allclose(out, ref_f32, atol=3e-2, rtol=3e-2), f"f32-ref max err {err_f32}"

    print("KERNEL_OK")
</pallas_src>

<mosaic_0001>
module attributes {stable_mosaic.version = 11 : i64} {
  func.func @_support_kernel(%arg0: i32, %arg1: memref<128x128xbf16, #tpu.memory_space<vmem>>, %arg2: memref<128x128xbf16, #tpu.memory_space<vmem>>, %arg3: memref<128x128xbf16, #tpu.memory_space<vmem>>) attributes {dimension_semantics = [#tpu.dimension_semantics<parallel>], iteration_bounds = array<i64: 2>, scalar_prefetch = 0 : i64, scratch_operands = 0 : i64, tpu.core_type = #tpu.core_type<tc>, window_params = [{transform_indices = @transform_0, window_bounds = array<i64: 128, 128>}, {pipeline_mode = #tpu.pipeline_mode<synchronous>, transform_indices = @transform_1, window_bounds = array<i64: 128, 128>}, {transform_indices = @transform_2, window_bounds = array<i64: 128, 128>}]} {
    %c0 = arith.constant 0 : index
    %c0_0 = arith.constant 0 : index
    %0 = vector.load %arg1[%c0, %c0_0] : memref<128x128xbf16, #tpu.memory_space<vmem>>, vector<128x128xbf16>
    %c0_1 = arith.constant 0 : index
    %c0_2 = arith.constant 0 : index
    %1 = vector.load %arg2[%c0_1, %c0_2] : memref<128x128xbf16, #tpu.memory_space<vmem>>, vector<128x128xbf16>
    %cst = arith.constant dense<0.000000e+00> : vector<128x128xf32>
    %2 = tpu.matmul %0, %1, %cst {dimension_numbers = #tpu.dot_dimension_numbers<[1], [0], [0], [1], [0, 0, 1, 1], [], []>} : vector<128x128xbf16>, vector<128x128xbf16>, vector<128x128xf32> -> vector<128x128xf32>
    %3 = arith.truncf %2 : vector<128x128xf32> to vector<128x128xbf16>
    %c0_3 = arith.constant 0 : index
    %c0_4 = arith.constant 0 : index
    %4 = vector.load %arg3[%c0_3, %c0_4] : memref<128x128xbf16, #tpu.memory_space<vmem>>, vector<128x128xbf16>
    tpu.vector_store %arg3[%c0_3, %c0_4], %3 {strides = array<i32>} : memref<128x128xbf16, #tpu.memory_space<vmem>>, vector<128x128xbf16>,
    return
  }
  func.func @transform_0(%arg0: i32) -> (i32, i32) {
    %c0_i32 = arith.constant 0 : i32
    %c0_i32_0 = arith.constant 0 : i32
    return %arg0, %c0_i32 : i32, i32
  }
  func.func @transform_1(%arg0: i32) -> (i32, i32) {
    %c0_i32 = arith.constant 0 : i32
    %c0_i32_0 = arith.constant 0 : i32
    %c0_i32_1 = arith.constant 0 : i32
    return %c0_i32, %c0_i32_0 : i32, i32
  }
  func.func @transform_2(%arg0: i32) -> (i32, i32) {
    %c0_i32 = arith.constant 0 : i32
    %c0_i32_0 = arith.constant 0 : i32
    return %arg0, %c0_i32 : i32, i32
  }
}

module attributes {stable_mosaic.version = 11 : i64} {
  func.func @_agg_relu_head_kernel(%arg0: i32, %arg1: memref<128x256xbf16, #tpu.memory_space<vmem>>, %arg2: memref<256x128xbf16, #tpu.memory_space<vmem>>, %arg3: memref<1x128xf32, #tpu.memory_space<vmem>>, %arg4: memref<128x128xbf16, #tpu.memory_space<vmem>>, %arg5: memref<1x128xf32, #tpu.memory_space<vmem>>, %arg6: memref<128x128xf32, #tpu.memory_space<vmem>>) attributes {dimension_semantics = [#tpu.dimension_semantics<parallel>], iteration_bounds = array<i64: 2>, scalar_prefetch = 0 : i64, scratch_operands = 0 : i64, tpu.core_type = #tpu.core_type<tc>, window_params = [{transform_indices = @transform_0, window_bounds = array<i64: 128, 256>}, {pipeline_mode = #tpu.pipeline_mode<synchronous>, transform_indices = @transform_1, window_bounds = array<i64: 256, 128>}, {pipeline_mode = #tpu.pipeline_mode<synchronous>, transform_indices = @transform_2, window_bounds = array<i64: 1, 128>}, {pipeline_mode = #tpu.pipeline_mode<synchronous>, transform_indices = @transform_3, window_bounds = array<i64: 128, 128>}, {pipeline_mode = #tpu.pipeline_mode<synchronous>, transform_indices = @transform_4, window_bounds = array<i64: 1, 128>}, {transform_indices = @transform_5, window_bounds = array<i64: 128, 128>}]} {
    %c0 = arith.constant 0 : index
    %c0_0 = arith.constant 0 : index
    %0 = vector.load %arg1[%c0, %c0_0] : memref<128x256xbf16, #tpu.memory_space<vmem>>, vector<128x256xbf16>
    %c0_1 = arith.constant 0 : index
    %c0_2 = arith.constant 0 : index
    %1 = vector.load %arg2[%c0_1, %c0_2] : memref<256x128xbf16, #tpu.memory_space<vmem>>, vector<256x128xbf16>
    %cst = arith.constant dense<0.000000e+00> : vector<128x128xf32>
    %2 = tpu.matmul %0, %1, %cst {dimension_numbers = #tpu.dot_dimension_numbers<[1], [0], [0], [1], [0, 0, 1, 1], [], []>} : vector<128x256xbf16>, vector<256x128xbf16>, vector<128x128xf32> -> vector<128x128xf32>
    %c0_3 = arith.constant 0 : index
    %c0_4 = arith.constant 0 : index
    %3 = vector.load %arg3[%c0_3, %c0_4] : memref<1x128xf32, #tpu.memory_space<vmem>>, vector<1x128xf32>
    %4 = vector.broadcast %3 : vector<1x128xf32> to vector<128x128xf32>
    %5 = arith.addf %2, %4 : vector<128x128xf32>
    %cst_5 = arith.constant 0.000000e+00 : f32
    %6 = vector.broadcast %cst_5 : f32 to vector<128x128xf32>
    %7 = arith.maximumf %5, %6 : vector<128x128xf32>
    %8 = arith.truncf %7 : vector<128x128xf32> to vector<128x128xbf16>
    %c0_6 = arith.constant 0 : index
    %c0_7 = arith.constant 0 : index
    %9 = vector.load %arg4[%c0_6, %c0_7] : memref<128x128xbf16, #tpu.memory_space<vmem>>, vector<128x128xbf16>
    %cst_8 = arith.constant dense<0.000000e+00> : vector<128x128xf32>
    %10 = tpu.matmul %8, %9, %cst_8 {dimension_numbers = #tpu.dot_dimension_numbers<[1], [0], [0], [1], [0, 0, 1, 1], [], []>} : vector<128x128xbf16>, vector<128x128xbf16>, vector<128x128xf32> -> vector<128x128xf32>
    %c0_9 = arith.constant 0 : index
    %c0_10 = arith.constant 0 : index
    %11 = vector.load %arg5[%c0_9, %c0_10] : memref<1x128xf32, #tpu.memory_space<vmem>>, vector<1x128xf32>
    %12 = vector.broadcast %11 : vector<1x128xf32> to vector<128x128xf32>
    %13 = arith.addf %10, %12 : vector<128x128xf32>
    %c0_11 = arith.constant 0 : index
    %c0_12 = arith.constant 0 : index
    %14 = vector.load %arg6[%c0_11, %c0_12] : memref<128x128xf32, #tpu.memory_space<vmem>>, vector<128x128xf32>
    tpu.vector_store %arg6[%c0_11, %c0_12], %13 {strides = array<i32>} : memref<128x128xf32, #tpu.memory_space<vmem>>, vector<128x128xf32>,
    return
  }
  func.func @transform_0(%arg0: i32) -> (i32, i32) {
    %c0_i32 = arith.constant 0 : i32
    %c0_i32_0 = arith.constant 0 : i32
    return %arg0, %c0_i32 : i32, i32
  }
  func.func @transform_1(%arg0: i32) -> (i32, i32) {
    %c0_i32 = arith.constant 0 : i32
    %c0_i32_0 = arith.constant 0 : i32
    %c0_i32_1 = arith.constant 0 : i32
    return %c0_i32, %c0_i32_0 : i32, i32
  }
  func.func @transform_2(%arg0: i32) -> (i32, i32) {
    %c0_i32 = arith.constant 0 : i32
    %c0_i32_0 = arith.constant 0 : i32
    %c0_i32_1 = arith.constant 0 : i32
    return %c0_i32, %c0_i32_0 : i32, i32
  }
  func.func @transform_3(%arg0: i32) -> (i32, i32) {
    %c0_i32 = arith.constant 0 : i32
    %c0_i32_0 = arith.constant 0 : i32
    %c0_i32_1 = arith.constant 0 : i32
    return %c0_i32, %c0_i32_0 : i32, i32
  }
  func.func @transform_4(%arg0: i32) -> (i32, i32) {
    %c0_i32 = arith.constant 0 : i32
    %c0_i32_0 = arith.constant 0 : i32
    %c0_i32_1 = arith.constant 0 : i32
    return %c0_i32, %c0_i32_0 : i32, i32
  }
  func.func @transform_5(%arg0: i32) -> (i32, i32) {
    %c0_i32 = arith.constant 0 : i32
    %c0_i32_0 = arith.constant 0 : i32
    return %arg0, %c0_i32 : i32, i32
  }
}

module attributes {stable_mosaic.version = 11 : i64} {
  func.func @_agg_relu_support_kernel(%arg0: i32, %arg1: memref<128x256xbf16, #tpu.memory_space<vmem>>, %arg2: memref<256x128xbf16, #tpu.memory_space<vmem>>, %arg3: memref<1x128xf32, #tpu.memory_space<vmem>>, %arg4: memref<128x128xbf16, #tpu.memory_space<vmem>>, %arg5: memref<128x128xbf16, #tpu.memory_space<vmem>>) attributes {dimension_semantics = [#tpu.dimension_semantics<parallel>], iteration_bounds = array<i64: 2>, scalar_prefetch = 0 : i64, scratch_operands = 0 : i64, tpu.core_type = #tpu.core_type<tc>, window_params = [{transform_indices = @transform_0, window_bounds = array<i64: 128, 256>}, {pipeline_mode = #tpu.pipeline_mode<synchronous>, transform_indices = @transform_1, window_bounds = array<i64: 256, 128>}, {pipeline_mode = #tpu.pipeline_mode<synchronous>, transform_indices = @transform_2, window_bounds = array<i64: 1, 128>}, {pipeline_mode = #tpu.pipeline_mode<synchronous>, transform_indices = @transform_3, window_bounds = array<i64: 128, 128>}, {transform_indices = @transform_4, window_bounds = array<i64: 128, 128>}]} {
    %c0 = arith.constant 0 : index
    %c0_0 = arith.constant 0 : index
    %0 = vector.load %arg1[%c0, %c0_0] : memref<128x256xbf16, #tpu.memory_space<vmem>>, vector<128x256xbf16>
    %c0_1 = arith.constant 0 : index
    %c0_2 = arith.constant 0 : index
    %1 = vector.load %arg2[%c0_1, %c0_2] : memref<256x128xbf16, #tpu.memory_space<vmem>>, vector<256x128xbf16>
    %cst = arith.constant dense<0.000000e+00> : vector<128x128xf32>
    %2 = tpu.matmul %0, %1, %cst {dimension_numbers = #tpu.dot_dimension_numbers<[1], [0], [0], [1], [0, 0, 1, 1], [], []>} : vector<128x256xbf16>, vector<256x128xbf16>, vector<128x128xf32> -> vector<128x128xf32>
    %c0_3 = arith.constant 0 : index
    %c0_4 = arith.constant 0 : index
    %3 = vector.load %arg3[%c0_3, %c0_4] : memref<1x128xf32, #tpu.memory_space<vmem>>, vector<1x128xf32>
    %4 = vector.broadcast %3 : vector<1x128xf32> to vector<128x128xf32>
    %5 = arith.addf %2, %4 : vector<128x128xf32>
    %cst_5 = arith.constant 0.000000e+00 : f32
    %6 = vector.broadcast %cst_5 : f32 to vector<128x128xf32>
    %7 = arith.maximumf %5, %6 : vector<128x128xf32>
    %8 = arith.truncf %7 : vector<128x128xf32> to vector<128x128xbf16>
    %c0_6 = arith.constant 0 : index
    %c0_7 = arith.constant 0 : index
    %9 = vector.load %arg4[%c0_6, %c0_7] : memref<128x128xbf16, #tpu.memory_space<vmem>>, vector<128x128xbf16>
    %cst_8 = arith.constant dense<0.000000e+00> : vector<128x128xf32>
    %10 = tpu.matmul %8, %9, %cst_8 {dimension_numbers = #tpu.dot_dimension_numbers<[1], [0], [0], [1], [0, 0, 1, 1], [], []>} : vector<128x128xbf16>, vector<128x128xbf16>, vector<128x128xf32> -> vector<128x128xf32>
    %11 = arith.truncf %10 : vector<128x128xf32> to vector<128x128xbf16>
    %c0_9 = arith.constant 0 : index
    %c0_10 = arith.constant 0 : index
    %12 = vector.load %arg5[%c0_9, %c0_10] : memref<128x128xbf16, #tpu.memory_space<vmem>>, vector<128x128xbf16>
    tpu.vector_store %arg5[%c0_9, %c0_10], %11 {strides = array<i32>} : memref<128x128xbf16, #tpu.memory_space<vmem>>, vector<128x128xbf16>,
    return
  }
  func.func @transform_0(%arg0: i32) -> (i32, i32) {
    %c0_i32 = arith.constant 0 : i32
    %c0_i32_0 = arith.constant 0 : i32
    return %arg0, %c0_i32 : i32, i32
  }
  func.func @transform_1(%arg0: i32) -> (i32, i32) {
    %c0_i32 = arith.constant 0 : i32
    %c0_i32_0 = arith.constant 0 : i32
    %c0_i32_1 = arith.constant 0 : i32
    return %c0_i32, %c0_i32_0 : i32, i32
  }
  func.func @transform_2(%arg0: i32) -> (i32, i32) {
    %c0_i32 = arith.constant 0 : i32
    %c0_i32_0 = arith.constant 0 : i32
    %c0_i32_1 = arith.constant 0 : i32
    return %c0_i32, %c0_i32_0 : i32, i32
  }
  func.func @transform_3(%arg0: i32) -> (i32, i32) {
    %c0_i32 = arith.constant 0 : i32
    %c0_i32_0 = arith.constant 0 : i32
    %c0_i32_1 = arith.constant 0 : i32
    return %c0_i32, %c0_i32_0 : i32, i32
  }
  func.func @transform_4(%arg0: i32) -> (i32, i32) {
    %c0_i32 = arith.constant 0 : i32
    %c0_i32_0 = arith.constant 0 : i32
    return %arg0, %c0_i32 : i32, i32
  }
}

</mosaic_0001>

<bundles_post_ra>
// kernel: gcn_forward.3
= control target key start
LH: loop header
LB: loop body
LE: loop exit
PB: predicated region body
PF: predicated region fallthrough
CT: control target
= control target key end

     0   :  { %s726_s9 = smov 0   ;;  %s784_s0 = inlined_call_operand.vmem [shape: bf16[256,128], index: 0, kind: input, shape index: {}]   ;;  %s785_s1 = inlined_call_operand.vmem [shape: bf16[128,128], index: 1, kind: input, shape index: {}]   ;;  %s786_s2 = inlined_call_operand.vmem [shape: bf16[256,128], index: 2, kind: output, shape index: {}]  }
   0x1 LB: > { %s509_s10 = sadd.s32 4294967295, %s709_s9   ;;  %p513_p0 = scmp.ge.s32.totalorder %s709_s9, 1  ;;  %s709_s9 = sphi %s726_s9, %s12_s9  }
   0x2   : > { %p113_p1 = scmp.lt.s32.totalorder %s709_s9, 3 }
   0x4   : > { %p114_p2 = pnand %p513_p0, %p113_p1 }
   0x5   : > { %s514_s13 = sshll.u32 (!%p114_p2), %s509_s10, 4 }
   0x6   : > { %117 = sbr.rel (%p114_p2) target bundleno = 254 (0xfe), region = 28  ;;  %p136_p3 = scmp.lt.s32.totalorder (!%p114_p2), %s514_s13, 31 }
   0xb   : > { %v687_v0 = vld [vmem:[%s785_s1 + $0x38] sm:$0xff]   ;;  %v688_v1 = vld [vmem:[%s785_s1 + $0x30] sm:$0xff]   ;;  %s788_s13 = smov (!%p136_p3, %s514_s13), 31  ;;  %v689_v2 = vld [vmem:[%s785_s1 + $0x28] sm:$0xff]  }
   0xc   : > { %631 = vmatprep.subr.bf16.mxu0 %v687_v0  ;;  %663 = vmatprep.subr.bf16.mxu1 %v687_v0  ;;  %s515_s18 = sshll.u32 %s788_s13, 2  ;;  %v690_v3 = vld [vmem:[%s785_s1 + $0x20] sm:$0xff]   ;;  %v691_v6 = vld [vmem:[%s785_s1 + $0x18] sm:$0xff]   ;;  %v692_v7 = vld [vmem:[%s785_s1 + $0x10] sm:$0xff]  }
   0xd   : > { %632 = vmatpush3.bf16.msra.mxu0 %v687_v0  ;;  %671 = vmatpush3.bf16.msra.mxu1 %v687_v0  ;;  %s751_s21 = scalar_lea.vmem %s784_s0, %s515_s18  ;;  %v693_v8 = vld [vmem:[%s785_s1 + $0x8] sm:$0xff]   ;;  %v694_v9 = vld [vmem:[%s785_s1] sm:$0xff]   ;;  %s145_s6 = scalar_lea.vmem %s786_s2, %s515_s18 }
   0xe   : > { %633 = vmatprep.subr.bf16.mxu0 %v688_v1  ;;  %664 = vmatprep.subr.bf16.mxu1 %v688_v1  ;;  %v695_v4 = vld [vmem:[%s751_s21] sm:$0xff]   ;;  %v697_v10 = vld [vmem:[%s751_s21 + $0x8] sm:$0xff]   ;;  %v699_v12 = vld [vmem:[%s751_s21 + $0x10] sm:$0xff]  }
   0xf   : > { %v696_v5 = vld [vmem:[%s751_s21 + $0x20] sm:$0xff]   ;;  %647 = vmatprep.mubr.bf16.mxu0 %v695_v4  ;;  %v698_v11 = vld [vmem:[%s751_s21 + $0x28] sm:$0xff]   ;;  %v700_v13 = vld [vmem:[%s751_s21 + $0x30] sm:$0xff]  }
  0x10   : > { %655 = vmatprep.mubr.bf16.mxu1 %v696_v5  ;;  %v701_v14 = vld [vmem:[%s751_s21 + $0x18] sm:$0xff]  }
  0x11   : > { %634 = vmatpush3.bf16.msra.mxu0 %v688_v1  ;;  %672 = vmatpush3.bf16.msra.mxu1 %v688_v1  ;;  %v702_v15 = vld [vmem:[%s751_s21 + $0x38] sm:$0xff]  }
  0x12   : > { %635 = vmatprep.subr.bf16.mxu0 %v689_v2  ;;  %665 = vmatprep.subr.bf16.mxu1 %v689_v2 }
  0x15   : > { %636 = vmatpush3.bf16.msra.mxu0 %v689_v2  ;;  %673 = vmatpush3.bf16.msra.mxu1 %v689_v2 }
  0x16   : > { %637 = vmatprep.subr.bf16.mxu0 %v690_v3  ;;  %666 = vmatprep.subr.bf16.mxu1 %v690_v3 }
  0x19   : > { %638 = vmatpush3.bf16.msra.mxu0 %v690_v3  ;;  %674 = vmatpush3.bf16.msra.mxu1 %v690_v3 }
  0x1a   : > { %639 = vmatprep.subr.bf16.mxu0 %v691_v6  ;;  %667 = vmatprep.subr.bf16.mxu1 %v691_v6 }
  0x1d   : > { %640 = vmatpush3.bf16.msra.mxu0 %v691_v6  ;;  %675 = vmatpush3.bf16.msra.mxu1 %v691_v6 }
  0x1e   : > { %641 = vmatprep.subr.bf16.mxu0 %v692_v7  ;;  %668 = vmatprep.subr.bf16.mxu1 %v692_v7 }
  0x21   : > { %642 = vmatpush3.bf16.msra.mxu0 %v692_v7  ;;  %676 = vmatpush3.bf16.msra.mxu1 %v692_v7 }
  0x22   : > { %643 = vmatprep.subr.bf16.mxu0 %v693_v8  ;;  %669 = vmatprep.subr.bf16.mxu1 %v693_v8 }
  0x25   : > { %644 = vmatpush3.bf16.msra.mxu0 %v693_v8  ;;  %677 = vmatpush3.bf16.msra.mxu1 %v693_v8 }
  0x26   : > { %645 = vmatprep.subr.bf16.mxu0 %v694_v9  ;;  %670 = vmatprep.subr.bf16.mxu1 %v694_v9 }
  0x29   : > { %646 = vmatpush3.bf16.msra.mxu0 %v694_v9  ;;  %678 = vmatpush3.bf16.msra.mxu1 %v694_v9 }
  0x2c   : > { %648 = vmatmul.mubr.bf16.vlgmr.msra.gmra.mxu0 %v697_v10  ;;  %656 = vmatmul.mubr.bf16.vlgmr.msra.gmra.mxu1 %v698_v11 }
  0x2d   : > { %651 = vmatprep.mubr.bf16.mxu0 %v699_v12  ;;  %659 = vmatprep.mubr.bf16.mxu1 %v700_v13 }
  0x34   : > { %652 = vmatmul.mubr.bf16.gmra.mxu0 %v701_v14  ;;  %660 = vmatmul.mubr.bf16.gmra.mxu1 %v702_v15 }
  0xec   : > { %v649_v16 = vpop.f32.mrf.mxu0  ;;  %v657_v17 = vpop.f32.mrf.mxu1 }
  0xee   : > { %v310_v18 = vpop.f32.mrf.mxu0  ;;  %v342_v19 = vpop.f32.mrf.mxu1 }
  0xf0   : > { %v650_v20 = vpop.f32.mrf.mxu0  ;;  %v658_v21 = vpop.f32.mrf.mxu1 }
  0xf1   : > { %v576_v22 = vpack.c.bf16 %v650_v20, %v649_v16  ;;  %v596_v23 = vpack.c.bf16 %v658_v21, %v657_v17 }
  0xf2   : > { %v313_v24 = vpop.f32.mrf.mxu0  ;;  %v345_v25 = vpop.f32.mrf.mxu1 }
  0xf3   : > { %608 = vst [vmem:[%s145_s6 + $0x8] sm:$0xff] %v576_v22   ;;  %612 = vst [vmem:[%s145_s6 + $0x28] sm:$0xff] %v596_v23   ;;  %v571_v26 = vpack.c.bf16 %v313_v24, %v310_v18  ;;  %v591_v27 = vpack.c.bf16 %v345_v25, %v342_v19 }
  0xf4   : > { %v653_v28 = vpop.f32.mrf.mxu0  ;;  %v661_v29 = vpop.f32.mrf.mxu1 }
  0xf5   : > { %572 = vst [vmem:[%s145_s6] sm:$0xff] %v571_v26   ;;  %611 = vst [vmem:[%s145_s6 + $0x20] sm:$0xff] %v591_v27  }
  0xf6   : > { %v326_v30 = vpop.f32.mrf.mxu0  ;;  %v358_v31 = vpop.f32.mrf.mxu1 }
  0xf8   : > { %v654_v32 = vpop.f32.mrf.mxu0  ;;  %v662_v33 = vpop.f32.mrf.mxu1 }
  0xf9   : > { %v586_v34 = vpack.c.bf16 %v654_v32, %v653_v28  ;;  %v606_v35 = vpack.c.bf16 %v662_v33, %v661_v29 }
  0xfa   : > { %v329_v36 = vpop.f32.mrf.mxu0  ;;  %v361_v37 = vpop.f32.mrf.mxu1 }
  0xfb   : > { %610 = vst [vmem:[%s145_s6 + $0x18] sm:$0xff] %v586_v34   ;;  %614 = vst [vmem:[%s145_s6 + $0x38] sm:$0xff] %v606_v35   ;;  %v581_v38 = vpack.c.bf16 %v329_v36, %v326_v30  ;;  %v601_v39 = vpack.c.bf16 %v361_v37, %v358_v31 }
  0xfd   : > { %609 = vst [vmem:[%s145_s6 + $0x10] sm:$0xff] %v581_v38   ;;  %613 = vst [vmem:[%s145_s6 + $0x30] sm:$0xff] %v601_v39  }
  0xfe PF: > { %s12_s9 = sadd.s32 1, %s709_s9  }
  0xff   : > { %p9_p4 = scmp.ge.s32.totalorder %s12_s9, 4  }
 0x101   :  { %11 = sbr.rel (!%p9_p4) target bundleno = 1 (0x1), region = 58 }

// kernel: gcn_forward.5
= control target key start
LH: loop header
LB: loop body
LE: loop exit
PB: predicated region body
PF: predicated region fallthrough
CT: control target
= control target key end

     0   :  { %s1085_s18 = smov 0   ;;  %s1241_s0 = inlined_call_operand.vmem [shape: bf16[256,256], index: 0, kind: input, shape index: {}]   ;;  %s1242_s1 = inlined_call_operand.vmem [shape: bf16[256,128], index: 1, kind: input, shape index: {}]   ;;  %s1243_s2 = inlined_call_operand.vmem [shape: f32[1,128], index: 2, kind: input, shape index: {}]   ;;  %s1244_s3 = inlined_call_operand.vmem [shape: bf16[128,128], index: 3, kind: input, shape index: {}]   ;;  %s1245_s4 = inlined_call_operand.vmem [shape: f32[1,128], index: 4, kind: input, shape index: {}]   ;;  %s1246_s5 = inlined_call_operand.vmem [shape: f32[256,128], index: 5, kind: output, shape index: {}]  }
   0x1 LB: > { %s824_s19 = sadd.s32 4294967295, %s1053_s18   ;;  %p828_p0 = scmp.ge.s32.totalorder %s1053_s18, 1  ;;  %s1053_s18 = sphi %s1085_s18, %s15_s18  }
   0x2   : > { %p189_p1 = scmp.lt.s32.totalorder %s1053_s18, 3 }
   0x4   : > { %p190_p2 = pnand %p828_p0, %p189_p1 }
   0x5   : > { %s829_s22 = sshll.u32 (!%p190_p2), %s824_s19, 4 }
   0x6   : > { %193 = sbr.rel (%p190_p2) target bundleno = 509 (0x1fd), region = 40  ;;  %p219_p3 = scmp.lt.s32.totalorder (!%p190_p2), %s829_s22, 31 }
   0xb   : > { %v999_v0 = vld [vmem:[%s1242_s1 + $0x78] sm:$0xff]   ;;  %v1001_v2 = vld [vmem:[%s1242_s1 + $0x70] sm:$0xff]   ;;  %v1003_v4 = vld [vmem:[%s1242_s1 + $0x68] sm:$0xff]   ;;  %s1248_s22 = smov (!%p219_p3, %s829_s22), 31 }
   0xc   : > { %v1000_v1 = vld [vmem:[%s1242_s1 + $0x38] sm:$0xff]   ;;  %879 = vmatprep.subr.bf16.mxu0 %v999_v0  ;;  %v1002_v3 = vld [vmem:[%s1242_s1 + $0x30] sm:$0xff]   ;;  %v1004_v5 = vld [vmem:[%s1242_s1 + $0x28] sm:$0xff]   ;;  %s878_s12 = sshll.u32 %s1248_s22, 3 }
   0xd   : > { %880 = vmatpush3.bf16.msra.mxu0 %v1000_v1  ;;  %v1005_v6 = vld [vmem:[%s1242_s1 + $0x60] sm:$0xff]   ;;  %v1007_v8 = vld [vmem:[%s1242_s1 + $0x58] sm:$0xff]   ;;  %s1128_s17 = scalar_lea.vmem %s1241_s0, %s878_s12  ;;  %v1009_v10 = vld [vmem:[%s1242_s1 + $0x50] sm:$0xff]   ;;  %s1220_s9 = scalar_lea.vmem %s1246_s5, %s878_s12 }
   0xe   : > { %881 = vmatprep.subr.bf16.mxu0 %v1001_v2  ;;  %v1006_v7 = vld [vmem:[%s1242_s1 + $0x20] sm:$0xff]   ;;  %v1008_v9 = vld [vmem:[%s1242_s1 + $0x18] sm:$0xff]   ;;  %v1010_v12 = vld [vmem:[%s1242_s1 + $0x10] sm:$0xff]  }
   0xf   : > { %v1017_v11 = vld [vmem:[%s1128_s17 + $0x4] ss:$8 sps:$4 sm:$0xff]   ;;  %v1039_v17 = vld [vmem:[%s1244_s3 + $0x38] sm:$0xff]   ;;  %v1015_v18 = vld [vmem:[%s1128_s17] ss:$8 sps:$4 sm:$0xff]  }
  0x10   : > { %495 = vmatprep.mubr.bf16.mxu0 %v1017_v11  ;;  %v1011_v13 = vld [vmem:[%s1242_s1 + $0x48] sm:$0xff]   ;;  %v1013_v15 = vld [vmem:[%s1242_s1 + $0x40] sm:$0xff]   ;;  %v1040_v19 = vld [vmem:[%s1244_s3 + $0x30] sm:$0xff]   ;;  %959 = vmatprep.subr.bf16.mxu1 %v1039_v17 }
  0x11   : > { %882 = vmatpush3.bf16.msra.mxu0 %v1002_v3  ;;  %v1012_v14 = vld [vmem:[%s1242_s1 + $0x8] sm:$0xff]   ;;  %v1014_v16 = vld [vmem:[%s1242_s1] sm:$0xff]   ;;  %v1018_v20 = vld [vmem:[%s1128_s17 + $0x14] ss:$8 sps:$4 sm:$0xff]   ;;  %960 = vmatpush3.bf16.msra.mxu1 %v1039_v17 }
  0x12   : > { %883 = vmatprep.subr.bf16.mxu0 %v1003_v4  ;;  %v1041_v21 = vld [vmem:[%s1244_s3 + $0x28] sm:$0xff]   ;;  %961 = vmatprep.subr.bf16.mxu1 %v1040_v19  ;;  %v1020_v22 = vld [vmem:[%s1128_s17 + $0x10] ss:$8 sps:$4 sm:$0xff]   ;;  %v1024_v25 = vld [vmem:[%s1128_s17 + $0x34] ss:$8 sps:$4 sm:$0xff]  }
  0x13   : > { %v1021_v23 = vld [vmem:[%s1128_s17 + $0x24] ss:$8 sps:$4 sm:$0xff]   ;;  %v1023_v24 = vld [vmem:[%s1128_s17 + $0x20] ss:$8 sps:$4 sm:$0xff]   ;;  %v1026_v26 = vld [vmem:[%s1128_s17 + $0x30] ss:$8 sps:$4 sm:$0xff]  }
  0x14   : > { %v1027_v27 = vld [vmem:[%s1128_s17 + $0x44] ss:$8 sps:$4 sm:$0xff]   ;;  %v1029_v28 = vld [vmem:[%s1128_s17 + $0x40] ss:$8 sps:$4 sm:$0xff]   ;;  %v1030_v29 = vld [vmem:[%s1128_s17 + $0x54] ss:$8 sps:$4 sm:$0xff]  }
  0x15   : > { %884 = vmatpush3.bf16.msra.mxu0 %v1004_v5  ;;  %962 = vmatpush3.bf16.msra.mxu1 %v1040_v19  ;;  %v1032_v30 = vld [vmem:[%s1128_s17 + $0x50] ss:$8 sps:$4 sm:$0xff]   ;;  %v1033_v31 = vld [vmem:[%s1128_s17 + $0x64] ss:$8 sps:$4 sm:$0xff]   ;;  %v1035_v32 = vld [vmem:[%s1128_s17 + $0x60] ss:$8 sps:$4 sm:$0xff]  }
  0x16   : > { %885 = vmatprep.subr.bf16.mxu0 %v1005_v6  ;;  %963 = vmatprep.subr.bf16.mxu1 %v1041_v21  ;;  %v1036_v33 = vld [vmem:[%s1128_s17 + $0x74] ss:$8 sps:$4 sm:$0xff]   ;;  %v1038_v34 = vld [vmem:[%s1128_s17 + $0x70] ss:$8 sps:$4 sm:$0xff]   ;;  %v1042_v35 = vld [vmem:[%s1244_s3 + $0x20] sm:$0xff]  }
  0x17   : > { %v1043_v36 = vld [vmem:[%s1244_s3 + $0x18] sm:$0xff]   ;;  %v1044_v37 = vld [vmem:[%s1244_s3 + $0x10] sm:$0xff]   ;;  %v1045_v38 = vld [vmem:[%s1244_s3 + $0x8] sm:$0xff]  }
  0x18   : > { %v1046_v39 = vld [vmem:[%s1244_s3] sm:$0xff]  }
  0x19   : > { %886 = vmatpush3.bf16.msra.mxu0 %v1006_v7  ;;  %964 = vmatpush3.bf16.msra.mxu1 %v1041_v21  ;;  %v1194_v44 = vld [vmem:[%s1243_s2] ss:$0 sm:$0xff] }
  0x1a   : > { %887 = vmatprep.subr.bf16.mxu0 %v1007_v8  ;;  %965 = vmatprep.subr.bf16.mxu1 %v1042_v35 }
  0x1d   : > { %888 = vmatpush3.bf16.msra.mxu0 %v1008_v9  ;;  %966 = vmatpush3.bf16.msra.mxu1 %v1042_v35 }
  0x1e   : > { %889 = vmatprep.subr.bf16.mxu0 %v1009_v10  ;;  %967 = vmatprep.subr.bf16.mxu1 %v1043_v36 }
  0x21   : > { %890 = vmatpush3.bf16.msra.mxu0 %v1010_v12  ;;  %968 = vmatpush3.bf16.msra.mxu1 %v1043_v36 }
  0x22   : > { %891 = vmatprep.subr.bf16.mxu0 %v1011_v13  ;;  %969 = vmatprep.subr.bf16.mxu1 %v1044_v37 }
  0x25   : > { %892 = vmatpush3.bf16.msra.mxu0 %v1012_v14  ;;  %970 = vmatpush3.bf16.msra.mxu1 %v1044_v37 }
  0x26   : > { %893 = vmatprep.subr.bf16.mxu0 %v1013_v15  ;;  %971 = vmatprep.subr.bf16.mxu1 %v1045_v38 }
  0x29   : > { %894 = vmatpush3.bf16.msra.mxu0 %v1014_v16  ;;  %972 = vmatpush3.bf16.msra.mxu1 %v1045_v38 }
  0x2a   : > { %973 = vmatprep.subr.bf16.mxu1 %v1046_v39 }
  0x2c   : > { %496 = vmatmul.mubr.bf16.vlgmr.msra.gmra.mxu0 %v1015_v18 }
  0x2d   : > { %503 = vmatprep.mubr.bf16.mxu0 %v1018_v20  ;;  %974 = vmatpush3.bf16.msra.mxu1 %v1046_v39 }
  0x34   : > { %504 = vmatmul.mubr.bf16.gmra.mxu0 %v1020_v22 }
  0x35   : > { %511 = vmatprep.mubr.bf16.mxu0 %v1021_v23 }
  0x3c   : > { %512 = vmatmul.mubr.bf16.gmra.mxu0 %v1023_v24 }
  0x3d   : > { %519 = vmatprep.mubr.bf16.mxu0 %v1024_v25 }
  0x44   : > { %520 = vmatmul.mubr.bf16.gmra.mxu0 %v1026_v26 }
  0x45   : > { %527 = vmatprep.mubr.bf16.mxu0 %v1027_v27 }
  0x4c   : > { %528 = vmatmul.mubr.bf16.gmra.mxu0 %v1029_v28 }
  0x4d   : > { %535 = vmatprep.mubr.bf16.mxu0 %v1030_v29 }
  0x54   : > { %536 = vmatmul.mubr.bf16.gmra.mxu0 %v1032_v30 }
  0x55   : > { %543 = vmatprep.mubr.bf16.mxu0 %v1033_v31 }
  0x5c   : > { %544 = vmatmul.mubr.bf16.gmra.mxu0 %v1035_v32 }
  0x5d   : > { %551 = vmatprep.mubr.bf16.mxu0 %v1036_v33 }
  0x64   : > { %552 = vmatmul.mubr.bf16.gmra.mxu0 %v1038_v34 }
  0xec   : > { %v895_v40 = vpop.f32.mrf.mxu0 }
  0xee   : > { %v896_v41 = vpop.f32.mrf.mxu0 }
  0xef   : > { %v897_v42 = vadd.f32 %v896_v41, %v895_v40 }
  0xf0   : > { %v898_v43 = vpop.f32.mrf.mxu0 }
  0xf1   : > { %v498_v47 = vadd.f32 %v897_v42, %v1194_v44 }
  0xf2   : > { %v899_v45 = vpop.f32.mrf.mxu0 }
  0xf3   : > { %v900_v46 = vadd.f32 %v899_v45, %v898_v43  ;;  %v560_v52 = vmax.f32 %v498_v47, 0.0 }
  0xf4   : > { %v901_v48 = vpop.f32.mrf.mxu0 }
  0xf5   : > { %v501_v49 = vadd.f32 %v900_v46, %v1194_v44 }
  0xf6   : > { %v902_v50 = vpop.f32.mrf.mxu0 }
  0xf7   : > { %v903_v51 = vadd.f32 %v902_v50, %v901_v48  ;;  %v561_v53 = vmax.f32 %v501_v49, 0.0 }
  0xf8   : > { %v904_v54 = vpop.f32.mrf.mxu0 }
  0xf9   : > { %v576_v55 = vpack.c.bf16 %v561_v53, %v560_v52  ;;  %v506_v57 = vadd.f32 %v903_v51, %v1194_v44 }
  0xfa   : > { %v905_v56 = vpop.f32.mrf.mxu0 }
  0xfb   : > { %v906_v58 = vadd.f32 %v905_v56, %v904_v54  ;;  %975 = vmatprep.mubr.bf16.mxu1 %v576_v55  ;;  %v562_v62 = vmax.f32 %v506_v57, 0.0 }
  0xfc   : > { %v907_v59 = vpop.f32.mrf.mxu0 }
  0xfd   : > { %v509_v60 = vadd.f32 %v906_v58, %v1194_v44 }
  0xfe   : > { %v908_v61 = vpop.f32.mrf.mxu0 }
  0xff   : > { %v563_v63 = vmax.f32 %v509_v60, 0.0  ;;  %v909_v0 = vadd.f32 %v908_v61, %v907_v59 }
 0x100   : > { %v910_v1 = vpop.f32.mrf.mxu0 }
 0x101   : > { %v577_v2 = vpack.c.bf16 %v563_v63, %v562_v62  ;;  %v514_v4 = vadd.f32 %v909_v0, %v1194_v44 }
 0x102   : > { %v911_v3 = vpop.f32.mrf.mxu0 }
 0x103   : > { %v912_v5 = vadd.f32 %v911_v3, %v910_v1  ;;  %976 = vmatmul.mubr.bf16.vlgmr.msra.gmra.mxu1 %v577_v2  ;;  %v564_v9 = vmax.f32 %v514_v4, 0.0  ;;  %v867_v2 = vld [vmem:[%s1245_s4] ss:$0 sm:$0xff] }
 0x104   : > { %v913_v6 = vpop.f32.mrf.mxu0 }
 0x105   : > { %v517_v7 = vadd.f32 %v912_v5, %v1194_v44 }
 0x106   : > { %v914_v8 = vpop.f32.mrf.mxu0 }
 0x107   : > { %v565_v10 = vmax.f32 %v517_v7, 0.0  ;;  %v915_v11 = vadd.f32 %v914_v8, %v913_v6 }
 0x108   : > { %v916_v12 = vpop.f32.mrf.mxu0 }
 0x109   : > { %v578_v13 = vpack.c.bf16 %v565_v10, %v564_v9  ;;  %v522_v15 = vadd.f32 %v915_v11, %v1194_v44 }
 0x10a   : > { %v917_v14 = vpop.f32.mrf.mxu0 }
 0x10b   : > { %v918_v16 = vadd.f32 %v917_v14, %v916_v12  ;;  %979 = vmatprep.mubr.bf16.mxu1 %v578_v13  ;;  %v566_v20 = vmax.f32 %v522_v15, 0.0 }
 0x10c   : > { %v919_v17 = vpop.f32.mrf.mxu0 }
 0x10d   : > { %v525_v18 = vadd.f32 %v918_v16, %v1194_v44 }
 0x10e   : > { %v920_v19 = vpop.f32.mrf.mxu0 }
 0x10f   : > { %v567_v21 = vmax.f32 %v525_v18, 0.0  ;;  %v921_v22 = vadd.f32 %v920_v19, %v919_v17 }
 0x110   : > { %v922_v23 = vpop.f32.mrf.mxu0 }
 0x111   : > { %v579_v24 = vpack.c.bf16 %v567_v21, %v566_v20  ;;  %v530_v26 = vadd.f32 %v921_v22, %v1194_v44 }
 0x112   : > { %v923_v25 = vpop.f32.mrf.mxu0 }
 0x113   : > { %v924_v27 = vadd.f32 %v923_v25, %v922_v23  ;;  %980 = vmatmul.mubr.bf16.gmra.mxu1 %v579_v24  ;;  %v568_v31 = vmax.f32 %v530_v26, 0.0 }
 0x114   : > { %v925_v28 = vpop.f32.mrf.mxu0 }
 0x115   : > { %v533_v29 = vadd.f32 %v924_v27, %v1194_v44 }
 0x116   : > { %v926_v30 = vpop.f32.mrf.mxu0 }
 0x117   : > { %v569_v32 = vmax.f32 %v533_v29, 0.0  ;;  %v927_v33 = vadd.f32 %v926_v30, %v925_v28 }
 0x118   : > { %v928_v34 = vpop.f32.mrf.mxu0 }
 0x119   : > { %v580_v35 = vpack.c.bf16 %v569_v32, %v568_v31  ;;  %v538_v37 = vadd.f32 %v927_v33, %v1194_v44 }
 0x11a   : > { %v929_v36 = vpop.f32.mrf.mxu0 }
 0x11b   : > { %v930_v38 = vadd.f32 %v929_v36, %v928_v34  ;;  %983 = vmatprep.mubr.bf16.mxu1 %v580_v35  ;;  %v570_v42 = vmax.f32 %v538_v37, 0.0 }
 0x11c   : > { %v931_v39 = vpop.f32.mrf.mxu0 }
 0x11d   : > { %v541_v40 = vadd.f32 %v930_v38, %v1194_v44 }
 0x11e   : > { %v932_v41 = vpop.f32.mrf.mxu0 }
 0x11f   : > { %v571_v43 = vmax.f32 %v541_v40, 0.0  ;;  %v933_v45 = vadd.f32 %v932_v41, %v931_v39 }
 0x120   : > { %v934_v46 = vpop.f32.mrf.mxu0 }
 0x121   : > { %v581_v47 = vpack.c.bf16 %v571_v43, %v570_v42  ;;  %v546_v49 = vadd.f32 %v933_v45, %v1194_v44 }
 0x122   : > { %v935_v48 = vpop.f32.mrf.mxu0 }
 0x123   : > { %v936_v50 = vadd.f32 %v935_v48, %v934_v46  ;;  %984 = vmatmul.mubr.bf16.gmra.mxu1 %v581_v47  ;;  %v572_v54 = vmax.f32 %v546_v49, 0.0 }
 0x124   : > { %v937_v51 = vpop.f32.mrf.mxu0 }
 0x125   : > { %v549_v52 = vadd.f32 %v936_v50, %v1194_v44 }
 0x126   : > { %v938_v53 = vpop.f32.mrf.mxu0 }
 0x127   : > { %v573_v55 = vmax.f32 %v549_v52, 0.0  ;;  %v939_v56 = vadd.f32 %v938_v53, %v937_v51 }
 0x128   : > { %v940_v57 = vpop.f32.mrf.mxu0 }
 0x129   : > { %v582_v58 = vpack.c.bf16 %v573_v55, %v572_v54  ;;  %v554_v60 = vadd.f32 %v939_v56, %v1194_v44 }
 0x12a   : > { %v941_v59 = vpop.f32.mrf.mxu0 }
 0x12b   : > { %v942_v61 = vadd.f32 %v941_v59, %v940_v57  ;;  %987 = vmatprep.mubr.bf16.mxu1 %v582_v58  ;;  %v574_v63 = vmax.f32 %v554_v60, 0.0 }
 0x12d   : > { %v557_v62 = vadd.f32 %v942_v61, %v1194_v44 }
 0x12f   : > { %v575_v0 = vmax.f32 %v557_v62, 0.0 }
 0x131   : > { %v583_v1 = vpack.c.bf16 %v575_v0, %v574_v63 }
 0x133   : > { %988 = vmatmul.mubr.bf16.gmra.mxu1 %v583_v1 }
 0x1c3   : > { %v977_v44 = vpop.f32.mrf.mxu1 }
 0x1c4   : > { %v698_v3 = vadd.f32 %v977_v44, %v867_v2 }
 0x1c5   : > { %v689_v4 = vpop.f32.mrf.mxu1 }
 0x1c6   : > { %754 = vst [vmem:[%s1220_s9 + $0x10] sm:$0xff] %v698_v3  ;;  %v690_v5 = vadd.f32 %v867_v2, %v689_v4 }
 0x1c7   : > { %v978_v6 = vpop.f32.mrf.mxu1 }
 0x1c8   : > { %752 = vst [vmem:[%s1220_s9] sm:$0xff] %v690_v5  ;;  %v701_v7 = vadd.f32 %v978_v6, %v867_v2 }
 0x1c9   : > { %v692_v8 = vpop.f32.mrf.mxu1 }
 0x1ca   : > { %755 = vst [vmem:[%s1220_s9 + $0x18] sm:$0xff] %v701_v7  ;;  %v693_v9 = vadd.f32 %v867_v2, %v692_v8 }
 0x1cc   : > { %753 = vst [vmem:[%s1220_s9 + $0x8] sm:$0xff] %v693_v9 }
 0x1d3   : > { %v981_v10 = vpop.f32.mrf.mxu1 }
 0x1d4   : > { %v714_v11 = vadd.f32 %v981_v10, %v867_v2 }
 0x1d5   : > { %v705_v12 = vpop.f32.mrf.mxu1 }
 0x1d6   : > { %758 = vst [vmem:[%s1220_s9 + $0x30] sm:$0xff] %v714_v11  ;;  %v706_v13 = vadd.f32 %v867_v2, %v705_v12 }
 0x1d7   : > { %v982_v14 = vpop.f32.mrf.mxu1 }
 0x1d8   : > { %756 = vst [vmem:[%s1220_s9 + $0x20] sm:$0xff] %v706_v13  ;;  %v717_v15 = vadd.f32 %v982_v14, %v867_v2 }
 0x1d9   : > { %v708_v16 = vpop.f32.mrf.mxu1 }
 0x1da   : > { %759 = vst [vmem:[%s1220_s9 + $0x38] sm:$0xff] %v717_v15  ;;  %v709_v17 = vadd.f32 %v867_v2, %v708_v16 }
 0x1dc   : > { %757 = vst [vmem:[%s1220_s9 + $0x28] sm:$0xff] %v709_v17 }
 0x1e3   : > { %v985_v18 = vpop.f32.mrf.mxu1 }
 0x1e4   : > { %v730_v19 = vadd.f32 %v985_v18, %v867_v2 }
 0x1e5   : > { %v721_v20 = vpop.f32.mrf.mxu1 }
 0x1e6   : > { %762 = vst [vmem:[%s1220_s9 + $0x50] sm:$0xff] %v730_v19  ;;  %v722_v21 = vadd.f32 %v867_v2, %v721_v20 }
 0x1e7   : > { %v986_v22 = vpop.f32.mrf.mxu1 }
 0x1e8   : > { %760 = vst [vmem:[%s1220_s9 + $0x40] sm:$0xff] %v722_v21  ;;  %v733_v23 = vadd.f32 %v986_v22, %v867_v2 }
 0x1e9   : > { %v724_v24 = vpop.f32.mrf.mxu1 }
 0x1ea   : > { %763 = vst [vmem:[%s1220_s9 + $0x58] sm:$0xff] %v733_v23  ;;  %v725_v25 = vadd.f32 %v867_v2, %v724_v24 }
 0x1ec   : > { %761 = vst [vmem:[%s1220_s9 + $0x48] sm:$0xff] %v725_v25 }
 0x1f3   : > { %v989_v26 = vpop.f32.mrf.mxu1 }
 0x1f4   : > { %v746_v27 = vadd.f32 %v989_v26, %v867_v2 }
 0x1f5   : > { %v737_v28 = vpop.f32.mrf.mxu1 }
 0x1f6   : > { %766 = vst [vmem:[%s1220_s9 + $0x70] sm:$0xff] %v746_v27  ;;  %v738_v29 = vadd.f32 %v867_v2, %v737_v28 }
 0x1f7   : > { %v990_v30 = vpop.f32.mrf.mxu1 }
 0x1f8   : > { %764 = vst [vmem:[%s1220_s9 + $0x60] sm:$0xff] %v738_v29  ;;  %v749_v31 = vadd.f32 %v990_v30, %v867_v2 }
 0x1f9   : > { %v740_v32 = vpop.f32.mrf.mxu1 }
 0x1fa   : > { %767 = vst [vmem:[%s1220_s9 + $0x78] sm:$0xff] %v749_v31  ;;  %v741_v33 = vadd.f32 %v867_v2, %v740_v32 }
 0x1fc   : > { %765 = vst [vmem:[%s1220_s9 + $0x68] sm:$0xff] %v741_v33 }
 0x1fd PF: > { %s15_s18 = sadd.s32 1, %s1053_s18  }
 0x1fe   : > { %p12_p4 = scmp.ge.s32.totalorder %s15_s18, 4  }
 0x200   :  { %14 = sbr.rel (!%p12_p4) target bundleno = 1 (0x1), region = 70 }

// kernel: gcn_forward.4
= control target key start
LH: loop header
LB: loop body
LE: loop exit
PB: predicated region body
PF: predicated region fallthrough
CT: control target
= control target key end

     0   :  { %s1188_s15 = smov 0   ;;  %s1320_s0 = inlined_call_operand.vmem [shape: bf16[256,256], index: 0, kind: input, shape index: {}]   ;;  %s1321_s1 = inlined_call_operand.vmem [shape: bf16[256,128], index: 1, kind: input, shape index: {}]   ;;  %s1322_s2 = inlined_call_operand.vmem [shape: f32[1,128], index: 2, kind: input, shape index: {}]   ;;  %s1323_s3 = inlined_call_operand.vmem [shape: bf16[128,128], index: 3, kind: input, shape index: {}]   ;;  %s1324_s4 = inlined_call_operand.vmem [shape: bf16[256,128], index: 4, kind: output, shape index: {}]  }
   0x1 LB: > { %s854_s16 = sadd.s32 4294967295, %s1161_s15   ;;  %p858_p0 = scmp.ge.s32.totalorder %s1161_s15, 1  ;;  %s1161_s15 = sphi %s1188_s15, %s14_s15  }
   0x2   : > { %p164_p1 = scmp.lt.s32.totalorder %s1161_s15, 3 }
   0x4   : > { %p165_p2 = pnand %p858_p0, %p164_p1 }
   0x5   : > { %s859_s19 = sshll.u32 (!%p165_p2), %s854_s16, 4 }
   0x6   : > { %168 = sbr.rel (%p165_p2) target bundleno = 509 (0x1fd), region = 36  ;;  %p192_p3 = scmp.lt.s32.totalorder (!%p165_p2), %s859_s19, 31 }
   0xb   : > { %v1107_v0 = vld [vmem:[%s1321_s1 + $0x78] sm:$0xff]   ;;  %v1109_v2 = vld [vmem:[%s1321_s1 + $0x70] sm:$0xff]   ;;  %v1111_v4 = vld [vmem:[%s1321_s1 + $0x68] sm:$0xff]   ;;  %s1326_s19 = smov (!%p192_p3, %s859_s19), 31 }
   0xc   : > { %v1108_v1 = vld [vmem:[%s1321_s1 + $0x38] sm:$0xff]   ;;  %987 = vmatprep.subr.bf16.mxu0 %v1107_v0  ;;  %v1110_v3 = vld [vmem:[%s1321_s1 + $0x30] sm:$0xff]   ;;  %v1112_v5 = vld [vmem:[%s1321_s1 + $0x28] sm:$0xff]   ;;  %s923_s8 = sshll.u32 %s1326_s19, 3  ;;  %s863_s24 = sshll.u32 %s1326_s19, 2 }
   0xd   : > { %988 = vmatpush3.bf16.msra.mxu0 %v1108_v1  ;;  %v1113_v6 = vld [vmem:[%s1321_s1 + $0x60] sm:$0xff]   ;;  %v1115_v8 = vld [vmem:[%s1321_s1 + $0x58] sm:$0xff]   ;;  %s1229_s13 = scalar_lea.vmem %s1320_s0, %s923_s8  ;;  %v1117_v10 = vld [vmem:[%s1321_s1 + $0x50] sm:$0xff]   ;;  %s202_s27 = scalar_lea.vmem %s1324_s4, %s863_s24 }
   0xe   : > { %989 = vmatprep.subr.bf16.mxu0 %v1109_v2  ;;  %v1114_v7 = vld [vmem:[%s1321_s1 + $0x20] sm:$0xff]   ;;  %v1116_v9 = vld [vmem:[%s1321_s1 + $0x18] sm:$0xff]   ;;  %v1118_v12 = vld [vmem:[%s1321_s1 + $0x10] sm:$0xff]  }
   0xf   : > { %v1125_v11 = vld [vmem:[%s1229_s13 + $0x4] ss:$8 sps:$4 sm:$0xff]   ;;  %v1147_v17 = vld [vmem:[%s1323_s3 + $0x38] sm:$0xff]   ;;  %v1123_v18 = vld [vmem:[%s1229_s13] ss:$8 sps:$4 sm:$0xff]  }
  0x10   : > { %468 = vmatprep.mubr.bf16.mxu0 %v1125_v11  ;;  %v1119_v13 = vld [vmem:[%s1321_s1 + $0x48] sm:$0xff]   ;;  %v1121_v15 = vld [vmem:[%s1321_s1 + $0x40] sm:$0xff]   ;;  %v1148_v19 = vld [vmem:[%s1323_s3 + $0x30] sm:$0xff]   ;;  %1067 = vmatprep.subr.bf16.mxu1 %v1147_v17 }
  0x11   : > { %990 = vmatpush3.bf16.msra.mxu0 %v1110_v3  ;;  %v1120_v14 = vld [vmem:[%s1321_s1 + $0x8] sm:$0xff]   ;;  %v1122_v16 = vld [vmem:[%s1321_s1] sm:$0xff]   ;;  %v1126_v20 = vld [vmem:[%s1229_s13 + $0x14] ss:$8 sps:$4 sm:$0xff]   ;;  %1068 = vmatpush3.bf16.msra.mxu1 %v1147_v17 }
  0x12   : > { %991 = vmatprep.subr.bf16.mxu0 %v1111_v4  ;;  %v1149_v21 = vld [vmem:[%s1323_s3 + $0x28] sm:$0xff]   ;;  %1069 = vmatprep.subr.bf16.mxu1 %v1148_v19  ;;  %v1128_v22 = vld [vmem:[%s1229_s13 + $0x10] ss:$8 sps:$4 sm:$0xff]   ;;  %v1132_v25 = vld [vmem:[%s1229_s13 + $0x34] ss:$8 sps:$4 sm:$0xff]  }
  0x13   : > { %v1129_v23 = vld [vmem:[%s1229_s13 + $0x24] ss:$8 sps:$4 sm:$0xff]   ;;  %v1131_v24 = vld [vmem:[%s1229_s13 + $0x20] ss:$8 sps:$4 sm:$0xff]   ;;  %v1134_v26 = vld [vmem:[%s1229_s13 + $0x30] ss:$8 sps:$4 sm:$0xff]  }
  0x14   : > { %v1135_v27 = vld [vmem:[%s1229_s13 + $0x44] ss:$8 sps:$4 sm:$0xff]   ;;  %v1137_v28 = vld [vmem:[%s1229_s13 + $0x40] ss:$8 sps:$4 sm:$0xff]   ;;  %v1138_v29 = vld [vmem:[%s1229_s13 + $0x54] ss:$8 sps:$4 sm:$0xff]  }
  0x15   : > { %992 = vmatpush3.bf16.msra.mxu0 %v1112_v5  ;;  %1070 = vmatpush3.bf16.msra.mxu1 %v1148_v19  ;;  %v1140_v30 = vld [vmem:[%s1229_s13 + $0x50] ss:$8 sps:$4 sm:$0xff]   ;;  %v1141_v31 = vld [vmem:[%s1229_s13 + $0x64] ss:$8 sps:$4 sm:$0xff]   ;;  %v1143_v32 = vld [vmem:[%s1229_s13 + $0x60] ss:$8 sps:$4 sm:$0xff]  }
  0x16   : > { %993 = vmatprep.subr.bf16.mxu0 %v1113_v6  ;;  %1071 = vmatprep.subr.bf16.mxu1 %v1149_v21  ;;  %v1144_v33 = vld [vmem:[%s1229_s13 + $0x74] ss:$8 sps:$4 sm:$0xff]   ;;  %v1146_v34 = vld [vmem:[%s1229_s13 + $0x70] ss:$8 sps:$4 sm:$0xff]   ;;  %v1150_v35 = vld [vmem:[%s1323_s3 + $0x20] sm:$0xff]  }
  0x17   : > { %v1151_v36 = vld [vmem:[%s1323_s3 + $0x18] sm:$0xff]   ;;  %v1152_v37 = vld [vmem:[%s1323_s3 + $0x10] sm:$0xff]   ;;  %v1153_v38 = vld [vmem:[%s1323_s3 + $0x8] sm:$0xff]  }
  0x18   : > { %v1154_v39 = vld [vmem:[%s1323_s3] sm:$0xff]  }
  0x19   : > { %994 = vmatpush3.bf16.msra.mxu0 %v1114_v7  ;;  %1072 = vmatpush3.bf16.msra.mxu1 %v1149_v21  ;;  %v1295_v44 = vld [vmem:[%s1322_s2] ss:$0 sm:$0xff] }
  0x1a   : > { %995 = vmatprep.subr.bf16.mxu0 %v1115_v8  ;;  %1073 = vmatprep.subr.bf16.mxu1 %v1150_v35 }
  0x1d   : > { %996 = vmatpush3.bf16.msra.mxu0 %v1116_v9  ;;  %1074 = vmatpush3.bf16.msra.mxu1 %v1150_v35 }
  0x1e   : > { %997 = vmatprep.subr.bf16.mxu0 %v1117_v10  ;;  %1075 = vmatprep.subr.bf16.mxu1 %v1151_v36 }
  0x21   : > { %998 = vmatpush3.bf16.msra.mxu0 %v1118_v12  ;;  %1076 = vmatpush3.bf16.msra.mxu1 %v1151_v36 }
  0x22   : > { %999 = vmatprep.subr.bf16.mxu0 %v1119_v13  ;;  %1077 = vmatprep.subr.bf16.mxu1 %v1152_v37 }
  0x25   : > { %1000 = vmatpush3.bf16.msra.mxu0 %v1120_v14  ;;  %1078 = vmatpush3.bf16.msra.mxu1 %v1152_v37 }
  0x26   : > { %1001 = vmatprep.subr.bf16.mxu0 %v1121_v15  ;;  %1079 = vmatprep.subr.bf16.mxu1 %v1153_v38 }
  0x29   : > { %1002 = vmatpush3.bf16.msra.mxu0 %v1122_v16  ;;  %1080 = vmatpush3.bf16.msra.mxu1 %v1153_v38 }
  0x2a   : > { %1081 = vmatprep.subr.bf16.mxu1 %v1154_v39 }
  0x2c   : > { %469 = vmatmul.mubr.bf16.vlgmr.msra.gmra.mxu0 %v1123_v18 }
  0x2d   : > { %476 = vmatprep.mubr.bf16.mxu0 %v1126_v20  ;;  %1082 = vmatpush3.bf16.msra.mxu1 %v1154_v39 }
  0x34   : > { %477 = vmatmul.mubr.bf16.gmra.mxu0 %v1128_v22 }
  0x35   : > { %484 = vmatprep.mubr.bf16.mxu0 %v1129_v23 }
  0x3c   : > { %485 = vmatmul.mubr.bf16.gmra.mxu0 %v1131_v24 }
  0x3d   : > { %492 = vmatprep.mubr.bf16.mxu0 %v1132_v25 }
  0x44   : > { %493 = vmatmul.mubr.bf16.gmra.mxu0 %v1134_v26 }
  0x45   : > { %500 = vmatprep.mubr.bf16.mxu0 %v1135_v27 }
  0x4c   : > { %501 = vmatmul.mubr.bf16.gmra.mxu0 %v1137_v28 }
  0x4d   : > { %508 = vmatprep.mubr.bf16.mxu0 %v1138_v29 }
  0x54   : > { %509 = vmatmul.mubr.bf16.gmra.mxu0 %v1140_v30 }
  0x55   : > { %516 = vmatprep.mubr.bf16.mxu0 %v1141_v31 }
  0x5c   : > { %517 = vmatmul.mubr.bf16.gmra.mxu0 %v1143_v32 }
  0x5d   : > { %524 = vmatprep.mubr.bf16.mxu0 %v1144_v33 }
  0x64   : > { %525 = vmatmul.mubr.bf16.gmra.mxu0 %v1146_v34 }
  0xec   : > { %v1003_v40 = vpop.f32.mrf.mxu0 }
  0xee   : > { %v1004_v41 = vpop.f32.mrf.mxu0 }
  0xef   : > { %v1005_v42 = vadd.f32 %v1004_v41, %v1003_v40 }
  0xf0   : > { %v1006_v43 = vpop.f32.mrf.mxu0 }
  0xf1   : > { %v471_v47 = vadd.f32 %v1005_v42, %v1295_v44 }
  0xf2   : > { %v1007_v45 = vpop.f32.mrf.mxu0 }
  0xf3   : > { %v1008_v46 = vadd.f32 %v1007_v45, %v1006_v43  ;;  %v533_v52 = vmax.f32 %v471_v47, 0.0 }
  0xf4   : > { %v1009_v48 = vpop.f32.mrf.mxu0 }
  0xf5   : > { %v474_v49 = vadd.f32 %v1008_v46, %v1295_v44 }
  0xf6   : > { %v1010_v50 = vpop.f32.mrf.mxu0 }
  0xf7   : > { %v1011_v51 = vadd.f32 %v1010_v50, %v1009_v48  ;;  %v534_v53 = vmax.f32 %v474_v49, 0.0 }
  0xf8   : > { %v1012_v54 = vpop.f32.mrf.mxu0 }
  0xf9   : > { %v549_v55 = vpack.c.bf16 %v534_v53, %v533_v52  ;;  %v479_v57 = vadd.f32 %v1011_v51, %v1295_v44 }
  0xfa   : > { %v1013_v56 = vpop.f32.mrf.mxu0 }
  0xfb   : > { %v1014_v58 = vadd.f32 %v1013_v56, %v1012_v54  ;;  %1083 = vmatprep.mubr.bf16.mxu1 %v549_v55  ;;  %v535_v62 = vmax.f32 %v479_v57, 0.0 }
  0xfc   : > { %v1015_v59 = vpop.f32.mrf.mxu0 }
  0xfd   : > { %v482_v60 = vadd.f32 %v1014_v58, %v1295_v44 }
  0xfe   : > { %v1016_v61 = vpop.f32.mrf.mxu0 }
  0xff   : > { %v536_v63 = vmax.f32 %v482_v60, 0.0  ;;  %v1017_v0 = vadd.f32 %v1016_v61, %v1015_v59 }
 0x100   : > { %v1018_v1 = vpop.f32.mrf.mxu0 }
 0x101   : > { %v550_v2 = vpack.c.bf16 %v536_v63, %v535_v62  ;;  %v487_v4 = vadd.f32 %v1017_v0, %v1295_v44 }
 0x102   : > { %v1019_v3 = vpop.f32.mrf.mxu0 }
 0x103   : > { %v1020_v5 = vadd.f32 %v1019_v3, %v1018_v1  ;;  %1084 = vmatmul.mubr.bf16.vlgmr.msra.gmra.mxu1 %v550_v2  ;;  %v537_v9 = vmax.f32 %v487_v4, 0.0 }
 0x104   : > { %v1021_v6 = vpop.f32.mrf.mxu0 }
 0x105   : > { %v490_v7 = vadd.f32 %v1020_v5, %v1295_v44 }
 0x106   : > { %v1022_v8 = vpop.f32.mrf.mxu0 }
 0x107   : > { %v538_v10 = vmax.f32 %v490_v7, 0.0  ;;  %v1023_v11 = vadd.f32 %v1022_v8, %v1021_v6 }
 0x108   : > { %v1024_v12 = vpop.f32.mrf.mxu0 }
 0x109   : > { %v551_v13 = vpack.c.bf16 %v538_v10, %v537_v9  ;;  %v495_v15 = vadd.f32 %v1023_v11, %v1295_v44 }
 0x10a   : > { %v1025_v14 = vpop.f32.mrf.mxu0 }
 0x10b   : > { %v1026_v16 = vadd.f32 %v1025_v14, %v1024_v12  ;;  %1087 = vmatprep.mubr.bf16.mxu1 %v551_v13  ;;  %v539_v20 = vmax.f32 %v495_v15, 0.0 }
 0x10c   : > { %v1027_v17 = vpop.f32.mrf.mxu0 }
 0x10d   : > { %v498_v18 = vadd.f32 %v1026_v16, %v1295_v44 }
 0x10e   : > { %v1028_v19 = vpop.f32.mrf.mxu0 }
 0x10f   : > { %v540_v21 = vmax.f32 %v498_v18, 0.0  ;;  %v1029_v22 = vadd.f32 %v1028_v19, %v1027_v17 }
 0x110   : > { %v1030_v23 = vpop.f32.mrf.mxu0 }
 0x111   : > { %v552_v24 = vpack.c.bf16 %v540_v21, %v539_v20  ;;  %v503_v26 = vadd.f32 %v1029_v22, %v1295_v44 }
 0x112   : > { %v1031_v25 = vpop.f32.mrf.mxu0 }
 0x113   : > { %v1032_v27 = vadd.f32 %v1031_v25, %v1030_v23  ;;  %1088 = vmatmul.mubr.bf16.gmra.mxu1 %v552_v24  ;;  %v541_v31 = vmax.f32 %v503_v26, 0.0 }
 0x114   : > { %v1033_v28 = vpop.f32.mrf.mxu0 }
 0x115   : > { %v506_v29 = vadd.f32 %v1032_v27, %v1295_v44 }
 0x116   : > { %v1034_v30 = vpop.f32.mrf.mxu0 }
 0x117   : > { %v542_v32 = vmax.f32 %v506_v29, 0.0  ;;  %v1035_v33 = vadd.f32 %v1034_v30, %v1033_v28 }
 0x118   : > { %v1036_v34 = vpop.f32.mrf.mxu0 }
 0x119   : > { %v553_v35 = vpack.c.bf16 %v542_v32, %v541_v31  ;;  %v511_v37 = vadd.f32 %v1035_v33, %v1295_v44 }
 0x11a   : > { %v1037_v36 = vpop.f32.mrf.mxu0 }
 0x11b   : > { %v1038_v38 = vadd.f32 %v1037_v36, %v1036_v34  ;;  %1091 = vmatprep.mubr.bf16.mxu1 %v553_v35  ;;  %v543_v42 = vmax.f32 %v511_v37, 0.0 }
 0x11c   : > { %v1039_v39 = vpop.f32.mrf.mxu0 }
 0x11d   : > { %v514_v40 = vadd.f32 %v1038_v38, %v1295_v44 }
 0x11e   : > { %v1040_v41 = vpop.f32.mrf.mxu0 }
 0x11f   : > { %v544_v43 = vmax.f32 %v514_v40, 0.0  ;;  %v1041_v45 = vadd.f32 %v1040_v41, %v1039_v39 }
 0x120   : > { %v1042_v46 = vpop.f32.mrf.mxu0 }
 0x121   : > { %v554_v47 = vpack.c.bf16 %v544_v43, %v543_v42  ;;  %v519_v49 = vadd.f32 %v1041_v45, %v1295_v44 }
 0x122   : > { %v1043_v48 = vpop.f32.mrf.mxu0 }
 0x123   : > { %v1044_v50 = vadd.f32 %v1043_v48, %v1042_v46  ;;  %1092 = vmatmul.mubr.bf16.gmra.mxu1 %v554_v47  ;;  %v545_v54 = vmax.f32 %v519_v49, 0.0 }
 0x124   : > { %v1045_v51 = vpop.f32.mrf.mxu0 }
 0x125   : > { %v522_v52 = vadd.f32 %v1044_v50, %v1295_v44 }
 0x126   : > { %v1046_v53 = vpop.f32.mrf.mxu0 }
 0x127   : > { %v546_v55 = vmax.f32 %v522_v52, 0.0  ;;  %v1047_v56 = vadd.f32 %v1046_v53, %v1045_v51 }
 0x128   : > { %v1048_v57 = vpop.f32.mrf.mxu0 }
 0x129   : > { %v555_v58 = vpack.c.bf16 %v546_v55, %v545_v54  ;;  %v527_v60 = vadd.f32 %v1047_v56, %v1295_v44 }
 0x12a   : > { %v1049_v59 = vpop.f32.mrf.mxu0 }
 0x12b   : > { %v1050_v61 = vadd.f32 %v1049_v59, %v1048_v57  ;;  %1095 = vmatprep.mubr.bf16.mxu1 %v555_v58  ;;  %v547_v63 = vmax.f32 %v527_v60, 0.0 }
 0x12d   : > { %v530_v62 = vadd.f32 %v1050_v61, %v1295_v44 }
 0x12f   : > { %v548_v0 = vmax.f32 %v530_v62, 0.0 }
 0x131   : > { %v556_v1 = vpack.c.bf16 %v548_v0, %v547_v63 }
 0x133   : > { %1096 = vmatmul.mubr.bf16.gmra.mxu1 %v556_v1 }
 0x1c3   : > { %v1085_v2 = vpop.f32.mrf.mxu1 }
 0x1c5   : > { %v655_v3 = vpop.f32.mrf.mxu1 }
 0x1c7   : > { %v1086_v4 = vpop.f32.mrf.mxu1 }
 0x1c8   : > { %v948_v5 = vpack.c.bf16 %v1086_v4, %v1085_v2 }
 0x1c9   : > { %v658_v6 = vpop.f32.mrf.mxu1 }
 0x1ca   : > { %980 = vst [vmem:[%s202_s27 + $0x8] sm:$0xff] %v948_v5   ;;  %v943_v7 = vpack.c.bf16 %v658_v6, %v655_v3 }
 0x1cc   : > { %944 = vst [vmem:[%s202_s27] sm:$0xff] %v943_v7  }
 0x1d3   : > { %v1089_v8 = vpop.f32.mrf.mxu1 }
 0x1d5   : > { %v671_v9 = vpop.f32.mrf.mxu1 }
 0x1d7   : > { %v1090_v44 = vpop.f32.mrf.mxu1 }
 0x1d8   : > { %v958_v10 = vpack.c.bf16 %v1090_v44, %v1089_v8 }
 0x1d9   : > { %v674_v11 = vpop.f32.mrf.mxu1 }
 0x1da   : > { %982 = vst [vmem:[%s202_s27 + $0x18] sm:$0xff] %v958_v10   ;;  %v953_v12 = vpack.c.bf16 %v674_v11, %v671_v9 }
 0x1dc   : > { %981 = vst [vmem:[%s202_s27 + $0x10] sm:$0xff] %v953_v12  }
 0x1e3   : > { %v1093_v13 = vpop.f32.mrf.mxu1 }
 0x1e5   : > { %v687_v14 = vpop.f32.mrf.mxu1 }
 0x1e7   : > { %v1094_v15 = vpop.f32.mrf.mxu1 }
 0x1e8   : > { %v968_v16 = vpack.c.bf16 %v1094_v15, %v1093_v13 }
 0x1e9   : > { %v690_v17 = vpop.f32.mrf.mxu1 }
 0x1ea   : > { %984 = vst [vmem:[%s202_s27 + $0x28] sm:$0xff] %v968_v16   ;;  %v963_v18 = vpack.c.bf16 %v690_v17, %v687_v14 }
 0x1ec   : > { %983 = vst [vmem:[%s202_s27 + $0x20] sm:$0xff] %v963_v18  }
 0x1f3   : > { %v1097_v19 = vpop.f32.mrf.mxu1 }
 0x1f5   : > { %v703_v20 = vpop.f32.mrf.mxu1 }
 0x1f7   : > { %v1098_v21 = vpop.f32.mrf.mxu1 }
 0x1f8   : > { %v978_v22 = vpack.c.bf16 %v1098_v21, %v1097_v19 }
 0x1f9   : > { %v706_v23 = vpop.f32.mrf.mxu1 }
 0x1fa   : > { %986 = vst [vmem:[%s202_s27 + $0x38] sm:$0xff] %v978_v22   ;;  %v973_v24 = vpack.c.bf16 %v706_v23, %v703_v20 }
 0x1fc   : > { %985 = vst [vmem:[%s202_s27 + $0x30] sm:$0xff] %v973_v24  }
 0x1fd PF: > { %s14_s15 = sadd.s32 1, %s1161_s15  }
 0x1fe   : > { %p11_p4 = scmp.ge.s32.totalorder %s14_s15, 4  }
 0x200   :  { %13 = sbr.rel (!%p11_p4) target bundleno = 1 (0x1), region = 66 }

</bundles_post_ra>
